<compile_context>
chip_gen: v6e
topology: v6e:2x2x1
jax: 0.10.0
libtpu: 0.0.40
codegen_flags: <defaults>
</compile_context>

<pallas_src>
import functools

import jax
import jax.numpy as jnp
from jax.experimental import pallas as pl
from jax.experimental.pallas import tpu as pltpu


def _kl_kernel(inv_rows, q_ref, p_ref, o_ref, acc_ref):
    """One grid step: accumulate sum_{rows in tile} sum_j P*log2(P/Q)."""
    i = pl.program_id(0)

    @pl.when(i == 0)
    def _init():
        acc_ref[...] = jnp.zeros_like(acc_ref)

    q = q_ref[...].astype(jnp.float32)          # (tB, N)
    p = p_ref[...].astype(jnp.float32)          # (tB, N)

    # P * log2(P / Q)  ==  P * (log2 P - log2 Q); probabilities are > 0.
    vals = p * (jnp.log2(p) - jnp.log2(q))      # (tB, N)

    # Row sum along lanes (XLU), then sublane sum -> (1, 1) tile total.
    row_sums = jnp.sum(vals, axis=-1, keepdims=True)           # (tB, 1)
    tile_total = jnp.sum(row_sums, axis=0, keepdims=True)      # (1, 1)
    acc_ref[...] += tile_total

    @pl.when(i == pl.num_programs(0) - 1)
    def _finalize():
        # mean over the batch axis = total / B
        o_ref[...] = acc_ref[...] * inv_rows


def kl_regular_pallas(q_pred, p_targ, *, row_tile=None):
    """KL(P || Q) in bits, summed over dim=1 and averaged over dim=0."""
    assert q_pred.shape == p_targ.shape
    B, N = q_pred.shape

    if row_tile is None:
        # Largest row tile (multiple of 8) that divides B; fall back to full B.
        row_tile = B
        for cand in (1024, 512, 256, 128, 64, 32, 16, 8):
            if cand <= B and B % cand == 0:
                row_tile = cand
                break
    assert B % row_tile == 0, "row_tile must divide the batch dimension"
    grid = (B // row_tile,)

    kernel = functools.partial(_kl_kernel, float(1.0 / B))

    out = pl.pallas_call(
        kernel,
        out_shape=jax.ShapeDtypeStruct((1, 1), jnp.float32),
        grid_spec=pltpu.PrefetchScalarGridSpec(
            num_scalar_prefetch=0,
            grid=grid,
            in_specs=[
                pl.BlockSpec((row_tile, N), lambda i: (i, 0)),   # Q_pred rows
                pl.BlockSpec((row_tile, N), lambda i: (i, 0)),   # P_targ rows
            ],
            # Output block is constant across the (reduction) grid axis -> it
            # stays resident in VMEM and is written back once at the end.
            out_specs=pl.BlockSpec((1, 1), lambda i: (0, 0)),
            scratch_shapes=[pltpu.VMEM((1, 1), jnp.float32)],    # accumulator
        ),
        compiler_params=pltpu.CompilerParams(
            dimension_semantics=("arbitrary",),      # accumulation axis
            vmem_limit_bytes=32 * 1024 * 1024,       # explicit; headroom on v7x
        ),
    )(q_pred, p_targ)
    return out[0, 0]


def kl_regular_ref(q_pred, p_targ):
    """Pure-JAX transcription of the PyTorch forward."""
    return jnp.mean(jnp.sum(p_targ * jnp.log2(p_targ / q_pred), axis=1))


if __name__ == "__main__":
    # Small shapes consistent with the module: batch=16 rows of 128-class
    # probability distributions (lane-dense last dim).
    B, N = 16, 128
    key = jax.random.PRNGKey(0)
    kq, kp = jax.random.split(key)
    q_pred = jax.nn.softmax(jax.random.normal(kq, (B, N), dtype=jnp.float32), axis=-1)
    p_targ = jax.nn.softmax(jax.random.normal(kp, (B, N), dtype=jnp.float32), axis=-1)

    # row_tile=8 -> grid=(2,) so the init/accumulate/finalize path is exercised.
    out = kl_regular_pallas(q_pred, p_targ, row_tile=8)
    out = jax.block_until_ready(out)

    ref = kl_regular_ref(q_pred, p_targ)
    assert out.shape == ()
    assert jnp.allclose(out, ref, atol=1e-5, rtol=1e-5), (float(out), float(ref))
    print("KERNEL_OK")
</pallas_src>

<mosaic_0001>
module attributes {stable_mosaic.version = 11 : i64} {
  func.func @_kl_kernel(%arg0: i32, %arg1: memref<8x128xf32, #tpu.memory_space<vmem>>, %arg2: memref<8x128xf32, #tpu.memory_space<vmem>>, %arg3: memref<1x1xf32, #tpu.memory_space<vmem>>, %arg4: memref<1x1xf32, #tpu.memory_space<vmem>>) attributes {dimension_semantics = [#tpu.dimension_semantics<arbitrary>], iteration_bounds = array<i64: 2>, scalar_prefetch = 0 : i64, scratch_operands = 1 : i64, tpu.core_type = #tpu.core_type<tc>, window_params = [{transform_indices = @transform_0, window_bounds = array<i64: 8, 128>}, {transform_indices = @transform_1, window_bounds = array<i64: 8, 128>}, {pipeline_mode = #tpu.pipeline_mode<synchronous>, transform_indices = @transform_2, window_bounds = array<i64: 1, 1>}]} {
    %c0_i32 = arith.constant 0 : i32
    %0 = arith.cmpi eq, %arg0, %c0_i32 : i32
    %1 = arith.extui %0 : i1 to i32
    %c0_i32_0 = arith.constant 0 : i32
    %2 = arith.cmpi ne, %1, %c0_i32_0 : i32
    scf.if %2 {
      %cst_12 = arith.constant 0.000000e+00 : f32
      %25 = vector.broadcast %cst_12 : f32 to vector<1x1xf32>
      %c0_13 = arith.constant 0 : index
      %c0_14 = arith.constant 0 : index
      %26 = vector.load %arg4[%c0_13, %c0_14] : memref<1x1xf32, #tpu.memory_space<vmem>>, vector<1x1xf32>
      tpu.vector_store %arg4[%c0_13, %c0_14], %25 {strides = array<i32>} : memref<1x1xf32, #tpu.memory_space<vmem>>, vector<1x1xf32>,
    } else {
    }
    %c0 = arith.constant 0 : index
    %c0_1 = arith.constant 0 : index
    %3 = vector.load %arg1[%c0, %c0_1] : memref<8x128xf32, #tpu.memory_space<vmem>>, vector<8x128xf32>
    %c0_2 = arith.constant 0 : index
    %c0_3 = arith.constant 0 : index
    %4 = vector.load %arg2[%c0_2, %c0_3] : memref<8x128xf32, #tpu.memory_space<vmem>>, vector<8x128xf32>
    %5 = math.log %4 : vector<8x128xf32>
    %cst = arith.constant 2.000000e+00 : f32
    %6 = math.log %cst : f32
    %7 = vector.broadcast %6 : f32 to vector<8x128xf32>
    %8 = arith.divf %5, %7 : vector<8x128xf32>
    %9 = math.log %3 : vector<8x128xf32>
    %cst_4 = arith.constant 2.000000e+00 : f32
    %10 = math.log %cst_4 : f32
    %11 = vector.broadcast %10 : f32 to vector<8x128xf32>
    %12 = arith.divf %9, %11 : vector<8x128xf32>
    %13 = arith.subf %8, %12 : vector<8x128xf32>
    %14 = arith.mulf %4, %13 : vector<8x128xf32>
    %cst_5 = arith.constant dense<0.000000e+00> : vector<8xf32>
    %15 = vector.multi_reduction <add>, %14, %cst_5 [1] : vector<8x128xf32> to vector<8xf32>
    %16 = vector.shape_cast %15 : vector<8xf32> to vector<8x1xf32>
    %cst_6 = arith.constant dense<0.000000e+00> : vector<1xf32>
    %17 = vector.multi_reduction <add>, %16, %cst_6 [0] : vector<8x1xf32> to vector<1xf32>
    %18 = vector.shape_cast %17 : vector<1xf32> to vector<1x1xf32>
    %c0_7 = arith.constant 0 : index
    %c0_8 = arith.constant 0 : index
    %19 = vector.load %arg4[%c0_7, %c0_8] : memref<1x1xf32, #tpu.memory_space<vmem>>, vector<1x1xf32>
    %20 = arith.addf %19, %18 : vector<1x1xf32>
    %c0_9 = arith.constant 0 : index
    %c0_10 = arith.constant 0 : index
    %21 = vector.load %arg4[%c0_9, %c0_10] : memref<1x1xf32, #tpu.memory_space<vmem>>, vector<1x1xf32>
    tpu.vector_store %arg4[%c0_9, %c0_10], %20 {strides = array<i32>} : memref<1x1xf32, #tpu.memory_space<vmem>>, vector<1x1xf32>,
    %c1_i32 = arith.constant 1 : i32
    %22 = arith.cmpi eq, %arg0, %c1_i32 : i32
    %23 = arith.extui %22 : i1 to i32
    %c0_i32_11 = arith.constant 0 : i32
    %24 = arith.cmpi ne, %23, %c0_i32_11 : i32
    scf.if %24 {
      %c0_12 = arith.constant 0 : index
      %c0_13 = arith.constant 0 : index
      %25 = vector.load %arg4[%c0_12, %c0_13] : memref<1x1xf32, #tpu.memory_space<vmem>>, vector<1x1xf32>
      %cst_14 = arith.constant 6.250000e-02 : f32
      %26 = vector.broadcast %cst_14 : f32 to vector<1x1xf32>
      %27 = arith.mulf %25, %26 : vector<1x1xf32>
      %c0_15 = arith.constant 0 : index
      %c0_16 = arith.constant 0 : index
      %28 = vector.load %arg3[%c0_15, %c0_16] : memref<1x1xf32, #tpu.memory_space<vmem>>, vector<1x1xf32>
      tpu.vector_store %arg3[%c0_15, %c0_16], %27 {strides = array<i32>} : memref<1x1xf32, #tpu.memory_space<vmem>>, vector<1x1xf32>,
    } else {
    }
    return
  }
  func.func @transform_0(%arg0: i32) -> (i32, i32) {
    %c0_i32 = arith.constant 0 : i32
    %c0_i32_0 = arith.constant 0 : i32
    return %arg0, %c0_i32 : i32, i32
  }
  func.func @transform_1(%arg0: i32) -> (i32, i32) {
    %c0_i32 = arith.constant 0 : i32
    %c0_i32_0 = arith.constant 0 : i32
    return %arg0, %c0_i32 : i32, i32
  }
  func.func @transform_2(%arg0: i32) -> (i32, i32) {
    %c0_i32 = arith.constant 0 : i32
    %c0_i32_0 = arith.constant 0 : i32
    %c0_i32_1 = arith.constant 0 : i32
    return %c0_i32, %c0_i32_0 : i32, i32
  }
}

</mosaic_0001>

<bundles_post_ra>
// kernel: tpu_custom_call.1
= control target key start
LH: loop header
LB: loop body
LE: loop exit
PB: predicated region body
PF: predicated region fallthrough
CT: control target
= control target key end

     0   :  { %7 = vsyncpa [#allocation4], 0  ;;  %s676_s0 = inlined_call_operand.hbm [shape: f32[16,128], index: 0, kind: input, shape index: {}]   ;;  %s677_s1 = inlined_call_operand.hbm [shape: f32[16,128], index: 1, kind: input, shape index: {}]   ;;  %s678_s2 = inlined_call_operand.hbm [shape: f32[1,1], index: 2, kind: output, shape index: {}]  }
   0x1   :  { %9 = vsyncpa [#allocation4 + $0x1], 0 }
   0x2   :  { %10 = vsyncpa [#allocation7], 0 }
   0x3   :  { %12 = vsyncpa [#allocation7 + $0x1], 0 }
   0x4   :  { %13 = vsyncpa [#allocation5], 0  ;;  %s515_s9 = smov 0   ;;  %s517_s10 = smov 0  }
   0x5   :  { %s519_s11 = smov 0   ;;  %s521_s12 = smov 0  }
   0x6 LB: > { %s534_s13 = sadd.s32 4294967295, %s494_s12   ;;  %s537_s14 = sadd.s32 1, %s494_s12   ;;  %s494_s12 = sphi %s521_s12, %s690_s12   ;;  %s490_s11 = sphi %s519_s11, %s689_s11   ;;  %s486_s10 = sphi %s517_s10, %s688_s10   ;;  %s482_s9 = sphi %s515_s9, %s687_s9  }
   0x7   : > { %s23_s15 = ssub.s32 %s494_s12, %s537_s14  ;;  %s26_s16 = sadd.s32 1, %s490_s11 }
   0x8   : > { %p24_p0 = scmp.eq.s32.totalorder %s23_s15, 0  ;;  %p33_p1 = scmp.ne.s32.totalorder %s490_s11, %s486_s10 }
   0x9   : > { %p34_p2 = scmp.eq.s32.totalorder %s494_s12, 0  ;;  %p39_p3 = scmp.ne.s32.totalorder %s486_s10, %s482_s9 }
   0xa   : > { %s547_s17 = scalar_select %p24_p0, %s490_s11, %s26_s16  }
   0xb   : > { %p35_p4 = por %p34_p2, %p33_p1  ;;  %p40_p5 = scmp.eq.s32.totalorder %s534_s13, 0 }
   0xc   : > { %p331_p6 = scmp.lt.s32.totalorder %s494_s12, 2  ;;  %s556_s19 = sand.u32 1, %s490_s11  }
   0xd   : > { %p551_p7 = por %p40_p5, %p39_p3  ;;  %s303_s20 = sshll.u32 %s556_s19, 3 }
   0xe   : > { %s304_s21 = sshll.u32 %s494_s12, 7  ;;  %s114_s25 = scalar_lea.vmem [#allocation3], %s303_s20 }
   0xf   : > { %s680_s18 = scalar_select %p551_p7, 1, 0 }
  0x10   : > { %s565_s24 = scalar_lea.hbm %s676_s0, %s304_s21  ;;  %s121_s26 = sshll.u32 %s114_s25, 4  ;;  %s569_s26 = int_to_ptr.vmem [resolvable:$true] %s121_s26 }
  0x11   : > { %p571_p8 = pnand %p331_p6, %p35_p4  ;;  %s111_s28 = scalar_lea.sflag [#allocation4], %s556_s19 }
  0x12   : > { %s372_s29 = scalar_lea.hbm %s565_s24, 128  ;;  %s377_s4 = scalar_lea.hbm %s676_s0, 256 }
  0x13   : > { %p373_p11 = scmp.ne.s32.totalorder %s565_s24, %s372_s29  ;;  %p374_p12 = pneg %p571_p8 }
  0x14   : > { %p378_p1 = scmp.lt.s32.totalorder %s565_s24, %s676_s0  ;;  %p379_p2 = scmp.lt.s32.totalorder %s377_s4, %s372_s29 }
  0x15   : > { %p375_p13 = pnand %p374_p12, %p373_p11 }
  0x16   : > { %p380_p3 = por %p379_p2, %p378_p1 }
  0x17   : > { %p376_p0 = pneg %p375_p13 }
  0x19   : > { %p381_p4 = pnand %p380_p3, %p376_p0 }
  0x1b   : > { %384 = shalt.err (!%p381_p4)
}
  0x1c   : > { %s385_s7 = scalar_lea.vmem %s569_s26, 128  ;;  %s496_s8 = smov [#allocation3]  }
  0x1d   : > { %p386_p5 = scmp.ne.s32.totalorder %s569_s26, %s385_s7  ;;  %s390_s9 = sshll.u32 %s496_s8, 4  ;;  %s391_s9 = int_to_ptr.vmem [resolvable:$false] %s390_s9 }
  0x1e   : > { %s392_s15 = scalar_lea.vmem %s391_s9, 256  ;;  %p393_p13 = scmp.lt.s32.totalorder %s569_s26, %s391_s9 }
  0x1f   : > { %p388_p6 = pnand %p386_p5, %p374_p12  ;;  %p394_p9 = scmp.lt.s32.totalorder %s392_s15, %s385_s7 }
  0x21   : > { %p389_p11 = pneg %p388_p6  ;;  %p395_p10 = por %p394_p9, %p393_p13 }
  0x23   : > { %p396_p1 = pnand %p395_p10, %p389_p11 }
  0x25   : > { %399 = shalt.err (!%p396_p1)
}
  0x26   : > { %327 = dma.hbm_to_vmem [thread:$0]  (!%p571_p8), %s565_s24, 128, %s569_s26, %s111_s28  }
  0x27   : > { %p682_p0 = scmp.lt.s32.totalorder %s494_s12, 3  ;;  %p683_p2 = scmp.ge.s32.totalorder %s494_s12, 1 }
  0x28   : > { %s615_s25 = scalar_lea.hbm %s677_s1, %s304_s21  ;;  %s132_s29 = scalar_lea.vmem [#allocation6], %s303_s20 }
  0x29   : > { %p606_p3 = pnand %p683_p2, %p682_p0  ;;  %s139_s30 = sshll.u32 %s132_s29, 4  ;;  %s140_s30 = int_to_ptr.vmem [resolvable:$true] %s139_s30 }
  0x2a   : > { %s129_s24 = scalar_lea.sflag [#allocation7], %s556_s19  ;;  %s400_s26 = scalar_lea.hbm %s615_s25, 128 }
  0x2b   : > { %s684_s16 = scalar_select %p606_p3, 1, 0 }
  0x2c   : > { %p401_p9 = scmp.ne.s32.totalorder %s615_s25, %s400_s26  ;;  %s405_s3 = scalar_lea.hbm %s677_s1, 256 }
  0x2d   : > { %p406_p5 = scmp.lt.s32.totalorder %s615_s25, %s677_s1  ;;  %p407_p6 = scmp.lt.s32.totalorder %s405_s3, %s400_s26 }
  0x2e   : > { %p403_p10 = pnand %p401_p9, %p374_p12 }
  0x2f   : > { %p408_p11 = por %p407_p6, %p406_p5 }
  0x30   : > { %p404_p4 = pneg %p403_p10 }
  0x32   : > { %p409_p13 = pnand %p408_p11, %p404_p4 }
  0x34   : > { %412 = shalt.err (!%p409_p13)
}
  0x35   : > { %s413_s20 = scalar_lea.vmem %s140_s30, 128  ;;  %s497_s19 = smov [#allocation6]  }
  0x36   : > { %p414_p1 = scmp.ne.s32.totalorder %s140_s30, %s413_s20  ;;  %s418_s5 = sshll.u32 %s497_s19, 4  ;;  %s419_s5 = int_to_ptr.vmem [resolvable:$false] %s418_s5 }
  0x37   : > { %s420_s6 = scalar_lea.vmem %s419_s5, 256  ;;  %p421_p9 = scmp.lt.s32.totalorder %s140_s30, %s419_s5 }
  0x38   : > { %p416_p0 = pnand %p414_p1, %p374_p12  ;;  %p422_p10 = scmp.lt.s32.totalorder %s420_s6, %s413_s20 }
  0x3a   : > { %p417_p2 = pneg %p416_p0  ;;  %p423_p7 = por %p422_p10, %p421_p9 }
  0x3c   : > { %p424_p3 = pnand %p423_p7, %p417_p2 }
  0x3e   : > { %427 = shalt.err (!%p424_p3)
}
  0x3f   : > { %330 = dma.hbm_to_vmem [thread:$0]  (!%p571_p8), %s615_s25, 128, %s140_s30, %s129_s24  }
  0x40   : > { %p685_p4 = scmp.ne.s32.totalorder %s684_s16, 0 }
  0x41   : > { %s150_s7 = sand.u32 (!%p685_p4), 1, %s486_s10   ;;  %p686_p12 = scmp.ne.s32.totalorder (!%p685_p4), %s680_s18, 0 }
  0x42   : > { %148 = sbr.rel (%p685_p4) target bundleno = 285 (0x11d), region = 28  ;;  %s308_s8 = sshll.u32 (!%p685_p4), %s150_s7, 3 }
  0x43   : > { %s151_s9 = scalar_lea.sflag (!%p685_p4), [#allocation4], %s150_s7  ;;  %s154_s15 = scalar_lea.vmem (!%p685_p4), [#allocation3], %s308_s8 }
  0x47   : > { %469 = dma.done.wait (%p686_p12), %s151_s9, 128  }
  0x48   : > { %471 = vsyncadd (%p686_p12), %s151_s9, 4294967168  ;;  %s160_s22 = scalar_lea.sflag [#allocation7], %s150_s7  ;;  %s163_s23 = scalar_lea.vmem [#allocation6], %s308_s8 }
  0x49   : > { %473 = dma.done.wait (%p686_p12), %s160_s22, 128  }
  0x4a   : > { %475 = vsyncadd (%p686_p12), %s160_s22, 4294967168  ;;  %p310_p7 = scmp.ne.s32.totalorder %s534_s13, 0 }
  0x4c   : > { %187 = sbr.rel (%p310_p7) target bundleno = 83 (0x53), region = 40 }
  0x51   : > { %vm188_vm0 = vcmask 0   ;;  %v498_v0 = vmov 0.0  }
  0x52   : > { %189 = vst.msk [vmem:[#allocation2] sm:$0x1] %vm188_vm0, %v498_v0 }
  0x53 PF: > { %v190_v1 = vld [vmem:[%s154_s15] sm:$0xff]  ;;  %v191_v2 = vld [vmem:[%s163_s23] sm:$0xff]  ;;  %vm211_vm1 = vcmask 0   ;;  %p311_p8 = scmp.ne.s32.totalorder %s534_s13, 1 }
  0x54   : > { %368 = vlog2.f32 %v191_v2 }
  0x55   : > { %370 = vlog2.f32 %v190_v1 }
  0x59   : > { %v209_v17 = vld [vmem:[#allocation2] sm:$0x1] }
  0x61   : > { %v369_v3 = vpop.eup %368 }
  0x62   : > { %v371_v4 = vpop.eup %370  ;;  %v193_v5 = vmul.f32 0.6931472, %v369_v3 }
  0x63   : > { %v197_v6 = vmul.f32 0.6931472, %v371_v4 }
  0x64   : > { %v195_v7 = vmul.f32 1.442695, %v193_v5 }
  0x65   : > { %v198_v8 = vmul.f32 1.442695, %v197_v6 }
  0x67   : > { %v199_v9 = vsub.f32 %v195_v7, %v198_v8 }
  0x69   : > { %v200_v10 = vmul.f32 %v199_v9, %v191_v2 }
  0x6b   : > { %201 = vadd.xlane.f32.xlu0 %v200_v10 }
  0xf4   : > { %v202_v11 = vpop.xlane.xlu0 %201 }
  0xf5   : > { %v203_v12 = vrot.slane %v202_v11, 4 }
  0xf7   : > { %v204_v13 = vadd.f32 %v203_v12, %v202_v11 }
  0xf9   : > { %v205_v14 = vrot.slane %v204_v13, 2 }
  0xfb   : > { %v206_v15 = vadd.f32 %v205_v14, %v204_v13 }
  0xfd   : > { %v207_v16 = vrot.slane %v206_v15, 1 }
  0xff   : > { %v208_v18 = vadd.f32 %v207_v16, %v206_v15  ;;  %216 = sbr.rel (%p311_p8) target bundleno = 270 (0x10e), region = 44 }
 0x101   : > { %v210_v19 = vadd.f32 %v209_v17, %v208_v18 }
 0x103   : > { %212 = vst.msk [vmem:[#allocation2] sm:$0x1] %vm211_vm1, %v210_v19 }
 0x10a   : > { %v217_v20 = vld [vmem:[#allocation2] sm:$0x1] }
 0x10b   : > { %v218_v21 = vmul.f32 0.0625, %v217_v20 }
 0x10d   : > { %219 = vst.msk [vmem:[#allocation8] sm:$0x1] %vm211_vm1, %v218_v21 }
 0x10e PF: > { %p332_p3 = scmp.eq.s32.totalorder %s534_s13, 1  ;;  %s499_s18 = smov [#allocation8]  }
 0x10f   : > { %s227_s27 = sshll.u32 %s499_s18, 4  ;;  %s228_s27 = int_to_ptr.vmem [resolvable:$true] %s227_s27 }
 0x110   : > { %s428_s16 = scalar_lea.vmem %s228_s27, 16  ;;  %s434_s25 = scalar_lea.vmem %s228_s27, 32 }
 0x111   : > { %p429_p5 = scmp.ne.s32.totalorder %s228_s27, %s428_s16  ;;  %p435_p13 = scmp.lt.s32.totalorder %s228_s27, %s228_s27 }
 0x112   : > { %p436_p1 = scmp.lt.s32.totalorder %s434_s25, %s428_s16 }
 0x113   : > { %p430_p6 = pnand %p429_p5, %p332_p3 }
 0x114   : > { %p437_p0 = por %p436_p1, %p435_p13 }
 0x115   : > { %p431_p11 = pneg %p430_p6 }
 0x117   : > { %p438_p2 = pnand %p437_p0, %p431_p11 }
 0x119   : > { %441 = shalt.err (!%p438_p2)
}
 0x11a   : > { %321 = dma.vmem_to_hbm [thread:$0]  (%p332_p3), %s228_s27, 16, %s678_s2, [#allocation5]  }
 0x11b   : > { %477 = dma.done.wait (%p332_p3), [#allocation5], 16  }
 0x11c   : > { %479 = vsyncadd (%p332_p3), [#allocation5], 4294967280 }
 0x11d PF: > { %p16_p9 = scmp.ge.s32.totalorder %s537_s14, 4   ;;  %s687_s9 = smov %s486_s10 }
 0x11e   : > { %s688_s10 = smov %s490_s11  ;;  %s689_s11 = smov %s547_s17 }
 0x11f   : > { %s690_s12 = smov %s537_s14  ;;  %18 = sbr.rel (!%p16_p9) target bundleno = 6 (0x6), region = 86 }
 0x124   :  { %240 = vsyncpa [#allocation4], 1 }
 0x125   :  { %242 = vsyncpa [#allocation4 + $0x1], 1 }
 0x126   :  { %243 = vsyncpa [#allocation7], 1 }
 0x127   :  { %245 = vsyncpa [#allocation7 + $0x1], 1 }
 0x128   :  { %246 = vsyncpa [#allocation5], 1 }
 0x129   :  { %248 = vsyncpa [#allocation5 + $0x1], 1 }

</bundles_post_ra>
